<compile_context>
chip_gen: v7x
topology: tpu7x:2x2x1
jax: 0.10.0
libtpu: 0.0.40
codegen_flags: <defaults>
</compile_context>

<pallas_src>
import jax
import jax.numpy as jnp
from jax.experimental import pallas as pl
from jax.experimental.pallas import tpu as pltpu


def _round_up(x: int, m: int) -> int:
    return (x + m - 1) // m * m


def classifier_kernel(x_ref, w1_ref, b1_ref, w2_ref, b2_ref, o_ref):
    # hidden = relu(x @ W1 + b1) ; bf16 operands, f32 accumulation.
    h = jnp.dot(x_ref[...], w1_ref[...], preferred_element_type=jnp.float32)
    h = jnp.maximum(h + b1_ref[...], 0.0)          # (TB, H) + (1, H), f32
    # out = h @ W2 + b2 ; cast activation back to bf16 for the MXU.
    o = jnp.dot(h.astype(jnp.bfloat16), w2_ref[...],
                preferred_element_type=jnp.float32)
    o_ref[...] = (o + b2_ref[...]).astype(o_ref.dtype)


def classifier_forward(x, w1, b1, w2, b2, *, batch_tile=512):
    """x: (B, n_feature); w1: (n_feature, n_hidden); b1: (n_hidden,)
       w2: (n_hidden, n_output); b2: (n_output,)
    Matches PyTorch Classifier.forward = Linear -> ReLU -> Linear."""
    B, n_feature = x.shape
    n_hidden = w1.shape[1]
    n_output = w2.shape[1]

    # Lane-dense padding of the contraction / output dims.
    F_pad = _round_up(n_feature, 128)
    H_pad = _round_up(n_hidden, 128)
    O_pad = _round_up(n_output, 128)

    # Batch tile: multiple of 16 (bf16 sublane packing), capped by batch_tile.
    TB = min(batch_tile, _round_up(B, 16))
    B_pad = _round_up(B, TB)

    # Zero-padded bf16 operands (weights/activations); f32 biases.
    xp = jnp.zeros((B_pad, F_pad), jnp.bfloat16)
    xp = xp.at[:B, :n_feature].set(x.astype(jnp.bfloat16))
    w1p = jnp.zeros((F_pad, H_pad), jnp.bfloat16)
    w1p = w1p.at[:n_feature, :n_hidden].set(w1.astype(jnp.bfloat16))
    b1p = jnp.zeros((1, H_pad), jnp.float32)
    b1p = b1p.at[0, :n_hidden].set(b1.astype(jnp.float32))
    w2p = jnp.zeros((H_pad, O_pad), jnp.bfloat16)
    w2p = w2p.at[:n_hidden, :n_output].set(w2.astype(jnp.bfloat16))
    b2p = jnp.zeros((1, O_pad), jnp.float32)
    b2p = b2p.at[0, :n_output].set(b2.astype(jnp.float32))

    grid = (B_pad // TB,)

    out_padded = pl.pallas_call(
        classifier_kernel,
        out_shape=jax.ShapeDtypeStruct((B_pad, O_pad), jnp.float32),
        grid_spec=pltpu.PrefetchScalarGridSpec(
            num_scalar_prefetch=0,
            grid=grid,
            in_specs=[
                # x tile marches along the batch axis.
                pl.BlockSpec((TB, F_pad), lambda i: (i, 0)),
                # Weights / biases are resident across all grid steps.
                pl.BlockSpec((F_pad, H_pad), lambda i: (0, 0)),
                pl.BlockSpec((1, H_pad), lambda i: (0, 0)),
                pl.BlockSpec((H_pad, O_pad), lambda i: (0, 0)),
                pl.BlockSpec((1, O_pad), lambda i: (0, 0)),
            ],
            out_specs=pl.BlockSpec((TB, O_pad), lambda i: (i, 0)),
        ),
        compiler_params=pltpu.CompilerParams(
            dimension_semantics=("parallel",),   # shard batch tiles on v7x's 2 TCs
            vmem_limit_bytes=64 << 20,
        ),
    )(xp, w1p, b1p, w2p, b2p)

    return out_padded[:B, :n_output].astype(x.dtype)


def init_classifier_params(key, n_feature, n_hidden, n_output):
    """Deterministic init mimicking torch.nn.Linear default
    (uniform +/- 1/sqrt(fan_in)). Weights returned as (in, out)."""
    k1, k2, k3, k4 = jax.random.split(key, 4)
    bound1 = 1.0 / jnp.sqrt(n_feature)
    bound2 = 1.0 / jnp.sqrt(n_hidden)
    w1 = jax.random.uniform(k1, (n_feature, n_hidden), jnp.float32, -bound1, bound1)
    b1 = jax.random.uniform(k2, (n_hidden,), jnp.float32, -bound1, bound1)
    w2 = jax.random.uniform(k3, (n_hidden, n_output), jnp.float32, -bound2, bound2)
    b2 = jax.random.uniform(k4, (n_output,), jnp.float32, -bound2, bound2)
    return w1, b1, w2, b2


if __name__ == "__main__":
    # Small shapes consistent with the module's forward.
    B, n_feature, n_hidden, n_output = 8, 32, 64, 16

    key = jax.random.PRNGKey(0)
    kx, kp = jax.random.split(key)
    x = jax.random.normal(kx, (B, n_feature), jnp.float32)
    w1, b1, w2, b2 = init_classifier_params(kp, n_feature, n_hidden, n_output)

    out = classifier_forward(x, w1, b1, w2, b2)
    out = jax.block_until_ready(out)

    # Pure-JAX f32 reference of the forward semantics; tolerance widened for
    # the bf16 operand cast (f32 accumulation keeps error ~0.5% relative).
    ref = jnp.maximum(x @ w1 + b1, 0.0) @ w2 + b2
    assert out.shape == (B, n_output)
    assert jnp.allclose(out, ref, atol=3e-2, rtol=3e-2), (
        float(jnp.max(jnp.abs(out - ref))))

    print("KERNEL_OK")
</pallas_src>

<mosaic_0001>
module attributes {stable_mosaic.version = 11 : i64} {
  func.func @classifier_kernel(%arg0: i32, %arg1: memref<16x128xbf16, #tpu.memory_space<vmem>>, %arg2: memref<128x128xbf16, #tpu.memory_space<vmem>>, %arg3: memref<1x128xf32, #tpu.memory_space<vmem>>, %arg4: memref<128x128xbf16, #tpu.memory_space<vmem>>, %arg5: memref<1x128xf32, #tpu.memory_space<vmem>>, %arg6: memref<16x128xf32, #tpu.memory_space<vmem>>) attributes {dimension_semantics = [#tpu.dimension_semantics<parallel>], iteration_bounds = array<i64: 1>, scalar_prefetch = 0 : i64, scratch_operands = 0 : i64, tpu.core_type = #tpu.core_type<tc>, window_params = [{transform_indices = @transform_0, window_bounds = array<i64: 16, 128>}, {pipeline_mode = #tpu.pipeline_mode<synchronous>, transform_indices = @transform_1, window_bounds = array<i64: 128, 128>}, {pipeline_mode = #tpu.pipeline_mode<synchronous>, transform_indices = @transform_2, window_bounds = array<i64: 1, 128>}, {pipeline_mode = #tpu.pipeline_mode<synchronous>, transform_indices = @transform_3, window_bounds = array<i64: 128, 128>}, {pipeline_mode = #tpu.pipeline_mode<synchronous>, transform_indices = @transform_4, window_bounds = array<i64: 1, 128>}, {transform_indices = @transform_5, window_bounds = array<i64: 16, 128>}]} {
    %c0 = arith.constant 0 : index
    %c0_0 = arith.constant 0 : index
    %0 = vector.load %arg1[%c0, %c0_0] : memref<16x128xbf16, #tpu.memory_space<vmem>>, vector<16x128xbf16>
    %c0_1 = arith.constant 0 : index
    %c0_2 = arith.constant 0 : index
    %1 = vector.load %arg2[%c0_1, %c0_2] : memref<128x128xbf16, #tpu.memory_space<vmem>>, vector<128x128xbf16>
    %cst = arith.constant dense<0.000000e+00> : vector<16x128xf32>
    %2 = tpu.matmul %0, %1, %cst {dimension_numbers = #tpu.dot_dimension_numbers<[1], [0], [0], [1], [0, 0, 1, 1], [], []>} : vector<16x128xbf16>, vector<128x128xbf16>, vector<16x128xf32> -> vector<16x128xf32>
    %c0_3 = arith.constant 0 : index
    %c0_4 = arith.constant 0 : index
    %3 = vector.load %arg3[%c0_3, %c0_4] : memref<1x128xf32, #tpu.memory_space<vmem>>, vector<1x128xf32>
    %4 = vector.broadcast %3 : vector<1x128xf32> to vector<16x128xf32>
    %5 = arith.addf %2, %4 : vector<16x128xf32>
    %cst_5 = arith.constant 0.000000e+00 : f32
    %6 = vector.broadcast %cst_5 : f32 to vector<16x128xf32>
    %7 = arith.maximumf %5, %6 : vector<16x128xf32>
    %8 = arith.truncf %7 : vector<16x128xf32> to vector<16x128xbf16>
    %c0_6 = arith.constant 0 : index
    %c0_7 = arith.constant 0 : index
    %9 = vector.load %arg4[%c0_6, %c0_7] : memref<128x128xbf16, #tpu.memory_space<vmem>>, vector<128x128xbf16>
    %cst_8 = arith.constant dense<0.000000e+00> : vector<16x128xf32>
    %10 = tpu.matmul %8, %9, %cst_8 {dimension_numbers = #tpu.dot_dimension_numbers<[1], [0], [0], [1], [0, 0, 1, 1], [], []>} : vector<16x128xbf16>, vector<128x128xbf16>, vector<16x128xf32> -> vector<16x128xf32>
    %c0_9 = arith.constant 0 : index
    %c0_10 = arith.constant 0 : index
    %11 = vector.load %arg5[%c0_9, %c0_10] : memref<1x128xf32, #tpu.memory_space<vmem>>, vector<1x128xf32>
    %12 = vector.broadcast %11 : vector<1x128xf32> to vector<16x128xf32>
    %13 = arith.addf %10, %12 : vector<16x128xf32>
    %c0_11 = arith.constant 0 : index
    %c0_12 = arith.constant 0 : index
    %14 = vector.load %arg6[%c0_11, %c0_12] : memref<16x128xf32, #tpu.memory_space<vmem>>, vector<16x128xf32>
    tpu.vector_store %arg6[%c0_11, %c0_12], %13 {strides = array<i32>} : memref<16x128xf32, #tpu.memory_space<vmem>>, vector<16x128xf32>,
    return
  }
  func.func @transform_0(%arg0: i32) -> (i32, i32) {
    %c0_i32 = arith.constant 0 : i32
    %c0_i32_0 = arith.constant 0 : i32
    return %arg0, %c0_i32 : i32, i32
  }
  func.func @transform_1(%arg0: i32) -> (i32, i32) {
    %c0_i32 = arith.constant 0 : i32
    %c0_i32_0 = arith.constant 0 : i32
    %c0_i32_1 = arith.constant 0 : i32
    return %c0_i32, %c0_i32_0 : i32, i32
  }
  func.func @transform_2(%arg0: i32) -> (i32, i32) {
    %c0_i32 = arith.constant 0 : i32
    %c0_i32_0 = arith.constant 0 : i32
    %c0_i32_1 = arith.constant 0 : i32
    return %c0_i32, %c0_i32_0 : i32, i32
  }
  func.func @transform_3(%arg0: i32) -> (i32, i32) {
    %c0_i32 = arith.constant 0 : i32
    %c0_i32_0 = arith.constant 0 : i32
    %c0_i32_1 = arith.constant 0 : i32
    return %c0_i32, %c0_i32_0 : i32, i32
  }
  func.func @transform_4(%arg0: i32) -> (i32, i32) {
    %c0_i32 = arith.constant 0 : i32
    %c0_i32_0 = arith.constant 0 : i32
    %c0_i32_1 = arith.constant 0 : i32
    return %c0_i32, %c0_i32_0 : i32, i32
  }
  func.func @transform_5(%arg0: i32) -> (i32, i32) {
    %c0_i32 = arith.constant 0 : i32
    %c0_i32_0 = arith.constant 0 : i32
    return %arg0, %c0_i32 : i32, i32
  }
}

</mosaic_0001>

<bundles_post_ra>
// kernel: tpu_custom_call.1
= control target key start
LH: loop header
LB: loop body
LE: loop exit
PB: predicated region body
PF: predicated region fallthrough
CT: control target
= control target key end

     0   :  { %10 = vsyncpa [#allocation3], 0  ;;  %s718_s0 = inlined_call_operand.hbm [shape: bf16[16,128], index: 0, kind: input, shape index: {}]   ;;  %s719_s1 = inlined_call_operand.hbm [shape: bf16[128,128], index: 1, kind: input, shape index: {}]   ;;  %s720_s2 = inlined_call_operand.hbm [shape: f32[1,128], index: 2, kind: input, shape index: {}]   ;;  %s721_s3 = inlined_call_operand.hbm [shape: bf16[128,128], index: 3, kind: input, shape index: {}]   ;;  %s722_s4 = inlined_call_operand.hbm [shape: f32[1,128], index: 4, kind: input, shape index: {}]   ;;  %s723_s5 = inlined_call_operand.hbm [shape: f32[16,128], index: 5, kind: output, shape index: {}]  }
   0x1   :  { %11 = vsyncpa [#allocation6], 0 }
   0x2   :  { %12 = vsyncpa [#allocation9], 0 }
   0x3   :  { %13 = vsyncpa [#allocation4], 0  ;;  %s588_s18 = smov [#allocation5]   ;;  %s589_s20 = smov [#allocation8]  }
   0x4   :  { %s31_s19 = sshll.u32 %s588_s18, 4  ;;  %s53_s21 = sshll.u32 %s589_s20, 4  ;;  %s32_s19 = int_to_ptr.vmem [resolvable:$true] %s31_s19  ;;  %s630_s21 = int_to_ptr.vmem [resolvable:$true] %s53_s21 }
   0x5   :  { %s448_s24 = scalar_lea.hbm %s719_s1, 1024 }
   0x6   :  { %p449_p0 = scmp.ne.s32.totalorder %s719_s1, %s448_s24  ;;  %p452_p1 = scmp.lt.u32.totalorder %s448_s24, %s719_s1 }
   0x8   :  { %p454_p2 = pnand %p452_p1, %p449_p0 }
   0xa   :  { %457 = shalt.err (!%p454_p2)
}
   0xb   :  { %s458_s29 = scalar_lea.vmem %s32_s19, 1024  ;;  %p463_p4 = scmp.lt.s32.totalorder %s32_s19, %s32_s19 }
   0xc   :  { %p459_p3 = scmp.ne.s32.totalorder %s32_s19, %s458_s29  ;;  %p464_p5 = scmp.lt.s32.totalorder %s458_s29, %s458_s29 }
   0xe   :  { %p465_p6 = por %p464_p5, %p463_p4 }
  0x10   :  { %p466_p7 = pnand %p465_p6, %p459_p3 }
  0x12   :  { %469 = shalt.err (!%p466_p7)
}
  0x13   :  { %s590_s30 = smov 64   ;;  %s591_s6 = smov 4  }
  0x14   :  { %37 = dma.hbm_to_vmem [thread:$0]  %s719_s1, 1024, %s32_s19, [#allocation6], %s590_s30, %s590_s30, %s591_s6  }
  0x15   :  { %s470_s11 = scalar_lea.hbm %s721_s3, 1024 }
  0x16   :  { %p471_p8 = scmp.ne.s32.totalorder %s721_s3, %s470_s11  ;;  %p474_p9 = scmp.lt.u32.totalorder %s470_s11, %s721_s3 }
  0x18   :  { %p476_p10 = pnand %p474_p9, %p471_p8 }
  0x1a   :  { %479 = shalt.err (!%p476_p10)
}
  0x1b   :  { %s480_s16 = scalar_lea.vmem %s630_s21, 1024  ;;  %p485_p12 = scmp.lt.s32.totalorder %s630_s21, %s630_s21 }
  0x1c   :  { %p481_p11 = scmp.ne.s32.totalorder %s630_s21, %s480_s16  ;;  %p486_p13 = scmp.lt.s32.totalorder %s480_s16, %s480_s16 }
  0x1e   :  { %p487_p0 = por %p486_p13, %p485_p12 }
  0x20   :  { %p488_p1 = pnand %p487_p0, %p481_p11 }
  0x22   :  { %491 = shalt.err (!%p488_p1)
}
  0x23   :  { %59 = dma.hbm_to_vmem [thread:$0]  %s721_s3, 1024, %s630_s21, [#allocation9], %s590_s30, %s590_s30, %s591_s6  }
  0x24   :  { %s592_s18 = smov [#allocation2]   ;;  %s593_s20 = smov [#allocation7]  }
  0x25   :  { %s19_s19 = sshll.u32 %s592_s18, 4  ;;  %s44_s22 = sshll.u32 %s593_s20, 4  ;;  %s20_s19 = int_to_ptr.vmem [resolvable:$true] %s19_s19  ;;  %s45_s22 = int_to_ptr.vmem [resolvable:$true] %s44_s22 }
  0x26   :  { %s492_s25 = scalar_lea.hbm %s718_s0, 128 }
  0x27   :  { %p493_p2 = scmp.ne.s32.totalorder %s718_s0, %s492_s25  ;;  %p496_p3 = scmp.lt.u32.totalorder %s492_s25, %s718_s0 }
  0x29   :  { %p498_p4 = pnand %p496_p3, %p493_p2 }
  0x2b   :  { %501 = shalt.err (!%p498_p4)
}
  0x2c   :  { %s502_s3 = scalar_lea.vmem %s20_s19, 128  ;;  %p507_p6 = scmp.lt.s32.totalorder %s20_s19, %s20_s19 }
  0x2d   :  { %p503_p5 = scmp.ne.s32.totalorder %s20_s19, %s502_s3  ;;  %p508_p7 = scmp.lt.s32.totalorder %s502_s3, %s502_s3 }
  0x2f   :  { %p509_p8 = por %p508_p7, %p507_p6 }
  0x31   :  { %p510_p9 = pnand %p509_p8, %p503_p5 }
  0x33   :  { %513 = shalt.err (!%p510_p9)
}
  0x34   :  { %25 = dma.hbm_to_vmem [thread:$0]  %s718_s0, 128, %s20_s19, [#allocation3], %s590_s30, %s590_s30, %s591_s6  }
  0x35   :  { %s514_s10 = scalar_lea.hbm %s720_s2, 16 }
  0x36   :  { %p515_p10 = scmp.ne.s32.totalorder %s720_s2, %s514_s10  ;;  %p518_p11 = scmp.lt.u32.totalorder %s514_s10, %s720_s2 }
  0x38   :  { %p520_p12 = pnand %p518_p11, %p515_p10 }
  0x3a   :  { %523 = shalt.err (!%p520_p12)
}
  0x3b   :  { %s524_s15 = scalar_lea.vmem %s45_s22, 16  ;;  %s528_s16 = scalar_lea.vmem %s45_s22, 32 }
  0x3c   :  { %p525_p13 = scmp.ne.s32.totalorder %s45_s22, %s524_s15  ;;  %p529_p0 = scmp.lt.s32.totalorder %s45_s22, %s45_s22 }
  0x3d   :  { %p530_p1 = scmp.lt.s32.totalorder %s528_s16, %s524_s15 }
  0x3f   :  { %p531_p2 = por %p530_p1, %p529_p0 }
  0x41   :  { %p532_p3 = pnand %p531_p2, %p525_p13 }
  0x43   :  { %535 = shalt.err (!%p532_p3)
}
  0x44   :  { %47 = dma.hbm_to_vmem [thread:$0]  %s720_s2, 16, %s45_s22, [#allocation6]  }
  0x45   :  { %s594_s6 = smov [#allocation10]   ;;  %s536_s19 = scalar_lea.hbm %s722_s4, 16 }
  0x46   :  { %s66_s1 = sshll.u32 %s594_s6, 4  ;;  %p537_p4 = scmp.ne.s32.totalorder %s722_s4, %s536_s19  ;;  %s67_s1 = int_to_ptr.vmem [resolvable:$true] %s66_s1 }
  0x47   :  { %p540_p5 = scmp.lt.u32.totalorder %s536_s19, %s722_s4 }
  0x49   :  { %p542_p6 = pnand %p540_p5, %p537_p4 }
  0x4b   :  { %545 = shalt.err (!%p542_p6)
}
  0x4c   :  { %s546_s26 = scalar_lea.vmem %s67_s1, 16  ;;  %s550_s2 = scalar_lea.vmem %s67_s1, 32 }
  0x4d   :  { %p547_p7 = scmp.ne.s32.totalorder %s67_s1, %s546_s26  ;;  %p551_p8 = scmp.lt.s32.totalorder %s67_s1, %s67_s1 }
  0x4e   :  { %p552_p9 = scmp.lt.s32.totalorder %s550_s2, %s546_s26 }
  0x50   :  { %p553_p10 = por %p552_p9, %p551_p8 }
  0x52   :  { %p554_p11 = pnand %p553_p10, %p547_p7 }
  0x54   :  { %557 = shalt.err (!%p554_p11)
}
  0x55   :  { %69 = dma.hbm_to_vmem [thread:$0]  %s722_s4, 16, %s67_s1, [#allocation9]  }
  0x56   :  { %580 = dma.done.wait [#allocation3], 128  }
  0x57   :  { %581 = vsyncadd [#allocation3], 4294967168 }
  0x58   :  { %582 = dma.done.wait [#allocation6], 1040  }
  0x59   :  { %583 = vsyncadd [#allocation6], 4294966256 }
  0x5a   :  { %584 = dma.done.wait [#allocation9], 1040  }
  0x5b   :  { %585 = vsyncadd [#allocation9], 4294966256  ;;  %v595_v0 = vmov 0.0   ;;  %vm596_vm0 = vmmov 0   ;;  %v431_v1 = vld [vmem:[#allocation5] sm:$0xff]   ;;  %v432_v2 = vld [vmem:[#allocation5 + $0x8] sm:$0xff]  }
  0x5c   :  { %379 = vmatprep.subr.bf16.mxu0 %v595_v0  ;;  %395 = vmatprep.mubr.msk.bf16.mxu0 %vm596_vm0, %v595_v0  ;;  %v433_v3 = vld [vmem:[#allocation5 + $0x10] sm:$0xff]   ;;  %v440_v4 = vld [vmem:[#allocation8] sm:$0xff]   ;;  %v434_v5 = vld [vmem:[#allocation5 + $0x18] sm:$0xff]   ;;  %s597_s4 = smov [#allocation11]  }
  0x5d   :  { %399 = vmatprep.subr.bf16.mxu1 %v595_v0  ;;  %415 = vmatprep.mubr.msk.bf16.mxu1 %vm596_vm0, %v595_v0  ;;  %v441_v6 = vld [vmem:[#allocation8 + $0x8] sm:$0xff]   ;;  %v435_v7 = vld [vmem:[#allocation5 + $0x20] sm:$0xff]   ;;  %v442_v8 = vld [vmem:[#allocation8 + $0x10] sm:$0xff]   ;;  %s328_s28 = sshll.u32 %s597_s4, 4  ;;  %s329_s28 = int_to_ptr.vmem [resolvable:$true] %s328_s28 }
  0x5e   :  { %380 = vmatpush3.bf16.msra.mxu0 %v431_v1  ;;  %400 = vmatpush3.bf16.msra.mxu1 %v440_v4  ;;  %v436_v9 = vld [vmem:[#allocation5 + $0x28] sm:$0xff]   ;;  %v443_v10 = vld [vmem:[#allocation8 + $0x18] sm:$0xff]   ;;  %v437_v11 = vld [vmem:[#allocation5 + $0x30] sm:$0xff]   ;;  %s558_s29 = scalar_lea.vmem %s329_s28, 256  ;;  %p563_p13 = scmp.lt.s32.totalorder %s329_s28, %s329_s28 }
  0x5f   :  { %381 = vmatprep.subr.bf16.mxu0 %v595_v0  ;;  %401 = vmatprep.subr.bf16.mxu1 %v595_v0  ;;  %v444_v12 = vld [vmem:[#allocation8 + $0x20] sm:$0xff]   ;;  %v438_v13 = vld [vmem:[#allocation5 + $0x38] sm:$0xff]   ;;  %v445_v14 = vld [vmem:[#allocation8 + $0x28] sm:$0xff]   ;;  %p559_p12 = scmp.ne.s32.totalorder %s329_s28, %s558_s29  ;;  %p564_p0 = scmp.lt.s32.totalorder %s558_s29, %s558_s29 }
  0x60   :  { %v439_v15 = vld [vmem:[#allocation2] sm:$0xff]   ;;  %v342_v18 = vld [vmem:[#allocation7] ss:$0 sm:$0xff]  ;;  %v352_v28 = vld [vmem:[#allocation10] ss:$0 sm:$0xff] }
  0x61   :  { %v446_v16 = vld [vmem:[#allocation8 + $0x30] sm:$0xff]   ;;  %v447_v17 = vld [vmem:[#allocation8 + $0x38] sm:$0xff]   ;;  %p565_p1 = por %p564_p0, %p563_p13 }
  0x62   :  { %382 = vmatpush3.bf16.msra.mxu0 %v432_v2  ;;  %402 = vmatpush3.bf16.msra.mxu1 %v441_v6 }
  0x63   :  { %383 = vmatprep.subr.bf16.mxu0 %v595_v0  ;;  %403 = vmatprep.subr.bf16.mxu1 %v595_v0  ;;  %p566_p2 = pnand %p565_p1, %p559_p12 }
  0x66   :  { %384 = vmatpush3.bf16.msra.mxu0 %v433_v3  ;;  %404 = vmatpush3.bf16.msra.mxu1 %v442_v8 }
  0x67   :  { %385 = vmatprep.subr.bf16.mxu0 %v595_v0  ;;  %405 = vmatprep.subr.bf16.mxu1 %v595_v0 }
  0x6a   :  { %386 = vmatpush3.bf16.msra.mxu0 %v434_v5  ;;  %406 = vmatpush3.bf16.msra.mxu1 %v443_v10 }
  0x6b   :  { %387 = vmatprep.subr.bf16.mxu0 %v595_v0  ;;  %407 = vmatprep.subr.bf16.mxu1 %v595_v0 }
  0x6e   :  { %388 = vmatpush3.bf16.msra.mxu0 %v435_v7  ;;  %408 = vmatpush3.bf16.msra.mxu1 %v444_v12 }
  0x6f   :  { %389 = vmatprep.subr.bf16.mxu0 %v595_v0  ;;  %409 = vmatprep.subr.bf16.mxu1 %v595_v0 }
  0x72   :  { %390 = vmatpush3.bf16.msra.mxu0 %v436_v9  ;;  %410 = vmatpush3.bf16.msra.mxu1 %v445_v14 }
  0x73   :  { %391 = vmatprep.subr.bf16.mxu0 %v595_v0  ;;  %411 = vmatprep.subr.bf16.mxu1 %v595_v0 }
  0x76   :  { %392 = vmatpush3.bf16.msra.mxu0 %v437_v11  ;;  %412 = vmatpush3.bf16.msra.mxu1 %v446_v16 }
  0x77   :  { %393 = vmatprep.subr.bf16.mxu0 %v595_v0  ;;  %413 = vmatprep.subr.bf16.mxu1 %v595_v0 }
  0x7a   :  { %394 = vmatpush3.bf16.msra.mxu0 %v438_v13  ;;  %414 = vmatpush3.bf16.msra.mxu1 %v447_v17 }
  0x7d   :  { %396 = vmatmul.mubr.bf16.vlgmr.msra.gmra.mrb[0].mxu0 %v439_v15 }
 0x150   :  { %v199_v19 = vpop.f32.mrb[0].mxu0 }
 0x151   :  { %v200_v20 = vadd.f32 %v342_v18, %v199_v19  ;;  %v397_v21 = vpop.f32.mrb[1].mxu0 }
 0x152   :  { %v202_v22 = vpop.f32.mrb[2].mxu0 }
 0x153   :  { %v203_v23 = vadd.f32 %v342_v18, %v202_v22  ;;  %v398_v24 = vpop.f32.mrb[3].mxu0  ;;  %v206_v25 = vmax.f32 %v200_v20, 0.0 }
 0x155   :  { %v207_v26 = vmax.f32 %v203_v23, 0.0 }
 0x157   :  { %v208_v27 = vpack.c.bf16 %v207_v26, %v206_v25 }
 0x159   :  { %416 = vmatmul.mubr.bf16.vlgmr.msra.gmra.mrb[0].mxu1 %v208_v27 }
 0x22c   :  { %v314_v29 = vpop.f32.mrb[0].mxu1 }
 0x22d   :  { %v315_v30 = vadd.f32 %v352_v28, %v314_v29  ;;  %v417_v31 = vpop.f32.mrb[1].mxu1 }
 0x22e   :  { %v317_v32 = vpop.f32.mrb[2].mxu1 }
 0x22f   :  { %321 = vst [vmem:[#allocation11] sm:$0xff] %v315_v30  ;;  %v318_v33 = vadd.f32 %v352_v28, %v317_v32  ;;  %v418_v34 = vpop.f32.mrb[3].mxu1 }
 0x231   :  { %322 = vst [vmem:[#allocation11 + $0x8] sm:$0xff] %v318_v33 }
 0x232   :  { %569 = shalt.err (!%p566_p2)
}
 0x233   :  { %s570_s7 = scalar_lea.hbm %s723_s5, 256 }
 0x234   :  { %p571_p3 = scmp.ne.s32.totalorder %s723_s5, %s570_s7  ;;  %p574_p4 = scmp.lt.u32.totalorder %s570_s7, %s723_s5 }
 0x236   :  { %p576_p5 = pnand %p574_p4, %p571_p3 }
 0x238   :  { %579 = shalt.err (!%p576_p5)
}
 0x239   :  { %s598_s12 = smov 128   ;;  %s599_s13 = smov 8  }
 0x23a   :  { %334 = dma.vmem_to_hbm [thread:$0]  %s329_s28, 256, %s723_s5, [#allocation4], %s598_s12, %s598_s12, %s599_s13  }
 0x23b   :  { %586 = dma.done.wait [#allocation4], 256  }
 0x23c   :  { %587 = vsyncadd [#allocation4], 4294967040 }
 0x23d   :  { %338 = vsyncpa [#allocation3], 1 }
 0x23e   :  { %339 = vsyncpa [#allocation6], 1 }
 0x23f   :  { %340 = vsyncpa [#allocation9], 1 }
 0x240   :  { %341 = vsyncpa [#allocation4], 1 }

</bundles_post_ra>
